<compile_context>
chip_gen: v5e
topology: v5e:2x2
jax: 0.10.0
libtpu: 0.0.40
codegen_flags: <defaults>
</compile_context>

<pallas_src>
import jax
import jax.numpy as jnp
from jax.experimental import pallas as pl
from jax.experimental.pallas import tpu as pltpu


def _cdiv(a: int, b: int) -> int:
    return -(-a // b)


def _round_up(a: int, m: int) -> int:
    return _cdiv(a, m) * m


def _num_tensorcores() -> int:
    """Best-effort TensorCore count (2 on v7x, 1 on v5e/v6e). Falls back to 1."""
    try:
        info = pltpu.get_tpu_info()
    except Exception:
        return 1
    for attr in ("num_tensorcores", "tensorcores_per_chip", "num_cores",
                 "cores_per_chip", "core_count"):
        v = getattr(info, attr, None)
        if isinstance(v, int) and 1 <= v <= 16:
            return v
    return 1


def _linear_kernel(x_ref, w_ref, o_ref):
    # One lane-dense MXU matmul per tile; fp32 accumulation regardless of I/O dtype.
    o_ref[...] = jnp.dot(
        x_ref[...], w_ref[...], preferred_element_type=jnp.float32
    ).astype(o_ref.dtype)


def _pack_weight(matrix: jax.Array, d: int):
    """Build the lane-dense block-diagonal weight for `x @ matrix.T`."""
    w = jnp.asarray(matrix).T.astype(jnp.float32)  # forward is x @ matrix.T
    if d <= 128:
        d_pad = max(1, int(pl.next_power_of_2(d)))
        pack = 128 // d_pad
    else:
        d_pad, pack = d, 1  # fallback: full-extent lane block (legal, not packed)
    lane = pack * d_pad
    if d_pad != d:
        w = jnp.zeros((d_pad, d_pad), jnp.float32).at[:d, :d].set(w)
    if pack > 1:
        # Block-diagonal weight: each packed particle hits its own copy of W.
        w = jnp.kron(jnp.eye(pack, dtype=jnp.float32), w)  # (lane, lane)
    return w, d_pad, pack, lane


def _apply_packed(x: jax.Array, w: jax.Array, d: int, d_pad: int, pack: int,
                  lane: int, block_rows: int) -> jax.Array:
    n = x.shape[0]
    io_dtype = x.dtype
    io_bytes = io_dtype.itemsize

    # Genuine low-precision path: cast the weight to the I/O dtype (fp32 accumulation kept).
    if jnp.issubdtype(io_dtype, jnp.floating) and io_bytes == 2:
        w = w.astype(io_dtype)
    w_bytes = w.dtype.itemsize

    # Sublane alignment of the second-to-last block dim per dtype: 8 (f32) / 16 (bf16).
    sub = max(8, 32 // io_bytes)

    # Clamp the requested tile against a 32 MiB VMEM budget (double-buffered in+out+weight).
    budget = 30 * 1024 * 1024 - 2 * lane * lane * w_bytes
    max_rows_vmem = max(sub, (budget // (4 * lane * io_bytes)) // sub * sub)
    block_rows = max(sub, min(block_rows, max_rows_vmem))

    rows = _cdiv(n, pack)
    br = _round_up(max(1, min(block_rows, rows)), sub)
    steps = _cdiv(rows, br)

    # Only split / even-out the grid on multi-TensorCore parts (v7x); never on v5e/v6e.
    if _num_tensorcores() >= 2:
        if steps == 1 and rows > sub:
            steps = 2
        if steps > 1 and steps % 2:
            steps += 1

    # Re-derive the tile so the work divides (nearly) evenly across `steps` grid steps.
    br = _round_up(_cdiv(rows, steps), sub)
    rows_pad = steps * br
    n_pad = rows_pad * pack

    xp = x
    if n_pad != n or d_pad != d:
        # TODO(synk): avoid this HBM round trip in chained D=6 transforms by keeping the
        # packed (rows, 128) layout between calls.
        xp = jnp.pad(x, ((0, n_pad - n), (0, d_pad - d)))
    xp = xp.reshape(rows_pad, lane)  # free bitcast when no padding was needed

    out = pl.pallas_call(
        _linear_kernel,
        out_shape=jax.ShapeDtypeStruct((rows_pad, lane), io_dtype),
        grid_spec=pltpu.PrefetchScalarGridSpec(
            num_scalar_prefetch=0,
            grid=(steps,),
            in_specs=[
                pl.BlockSpec((br, lane), lambda i: (i, 0)),    # lane-dense particle tile
                pl.BlockSpec((lane, lane), lambda i: (0, 0)),  # resident weight block
            ],
            out_specs=pl.BlockSpec((br, lane), lambda i: (i, 0)),
        ),
        compiler_params=pltpu.CompilerParams(
            dimension_semantics=("parallel",),
            vmem_limit_bytes=32 * 1024 * 1024,  # safe on v5e/v6e (128 MiB) and v7x (64 MiB)
        ),
    )(xp, w)

    return out.reshape(rows_pad * pack, d_pad)[:n, :d]


def linear_transform(x: jax.Array, matrix: jax.Array, *, block_rows: int = 8192) -> jax.Array:
    """Pallas forward pass of LinearTransform: returns x @ matrix.T (same dtype as x)."""
    n, d = x.shape
    assert matrix.shape == (d, d)
    w, d_pad, pack, lane = _pack_weight(matrix, d)
    return _apply_packed(x, w, d, d_pad, pack, lane, block_rows)


class LinearTransform:
    """Mirror of the PyTorch module with per-transform cached packed weights."""

    def __init__(self, matrix: jax.Array) -> None:
        self.set_matrix(matrix)

    def set_matrix(self, matrix: jax.Array) -> None:
        matrix = jnp.asarray(matrix, jnp.float32)
        self.matrix = matrix
        self.matrix_inv = jnp.linalg.inv(matrix)  # parameter setup, not a Pallas kernel
        self._d = matrix.shape[0]
        self._fwd = _pack_weight(self.matrix, self._d)
        self._inv = _pack_weight(self.matrix_inv, self._d)

    def forward(self, x: jax.Array, *, block_rows: int = 8192) -> jax.Array:
        w, d_pad, pack, lane = self._fwd
        return _apply_packed(x, w, self._d, d_pad, pack, lane, block_rows)

    def inverse(self, u: jax.Array, *, block_rows: int = 8192) -> jax.Array:
        w, d_pad, pack, lane = self._inv
        return _apply_packed(u, w, self._d, d_pad, pack, lane, block_rows)

    __call__ = forward


if __name__ == "__main__":
    key = jax.random.PRNGKey(0)
    kx, km = jax.random.split(key)

    # Small shapes consistent with the module: N particles x D phase-space coordinates.
    N, D = 256, 8
    x = jax.random.normal(kx, (N, D), dtype=jnp.float32)
    matrix = (jnp.eye(D, dtype=jnp.float32)
              + 0.05 * jax.random.normal(km, (D, D), dtype=jnp.float32))
    ref = x @ matrix.T

    out = jax.block_until_ready(linear_transform(x, matrix))
    assert out.shape == (N, D)
    assert jnp.allclose(out, ref, atol=1e-4, rtol=1e-4), "mismatch vs reference (D=8, f32)"

    # Coordinate-padding path (typical 6-D phase space, ragged N).
    N2, D2 = 100, 6
    x2 = jax.random.normal(kx, (N2, D2), dtype=jnp.float32)
    m2 = (jnp.eye(D2, dtype=jnp.float32)
          + 0.05 * jax.random.normal(km, (D2, D2), dtype=jnp.float32))
    out2 = jax.block_until_ready(linear_transform(x2, m2))
    assert jnp.allclose(out2, x2 @ m2.T, atol=1e-4, rtol=1e-4), "mismatch vs reference (D=6)"

    # Genuine bf16 I/O path: both operands bf16, fp32 accumulation, bf16 output.
    xb = x.astype(jnp.bfloat16)
    outb = jax.block_until_ready(linear_transform(xb, matrix))
    assert outb.dtype == jnp.bfloat16
    assert jnp.allclose(outb.astype(jnp.float32), ref, atol=5e-2, rtol=5e-2), \
        "mismatch vs reference (bf16)"

    # Cached-weight module: forward + inverse round trip.
    lt = LinearTransform(matrix)
    y = lt.forward(x)
    x_rec = jax.block_until_ready(lt.inverse(y))
    assert jnp.allclose(x_rec, x, atol=1e-3, rtol=1e-3), "inverse round-trip mismatch"

    print("KERNEL_OK")
</pallas_src>

<mosaic_0001>
module attributes {stable_mosaic.version = 11 : i64} {
  func.func @_linear_kernel(%arg0: i32, %arg1: memref<16x128xf32, #tpu.memory_space<vmem>>, %arg2: memref<128x128xf32, #tpu.memory_space<vmem>>, %arg3: memref<16x128xf32, #tpu.memory_space<vmem>>) attributes {dimension_semantics = [#tpu.dimension_semantics<parallel>], iteration_bounds = array<i64: 1>, scalar_prefetch = 0 : i64, scratch_operands = 0 : i64, tpu.core_type = #tpu.core_type<tc>, window_params = [{transform_indices = @transform_0, window_bounds = array<i64: 16, 128>}, {pipeline_mode = #tpu.pipeline_mode<synchronous>, transform_indices = @transform_1, window_bounds = array<i64: 128, 128>}, {transform_indices = @transform_2, window_bounds = array<i64: 16, 128>}]} {
    %c0 = arith.constant 0 : index
    %c0_0 = arith.constant 0 : index
    %0 = vector.load %arg1[%c0, %c0_0] : memref<16x128xf32, #tpu.memory_space<vmem>>, vector<16x128xf32>
    %c0_1 = arith.constant 0 : index
    %c0_2 = arith.constant 0 : index
    %1 = vector.load %arg2[%c0_1, %c0_2] : memref<128x128xf32, #tpu.memory_space<vmem>>, vector<128x128xf32>
    %cst = arith.constant dense<0.000000e+00> : vector<16x128xf32>
    %2 = tpu.matmul %0, %1, %cst {dimension_numbers = #tpu.dot_dimension_numbers<[1], [0], [0], [1], [0, 0, 1, 1], [], []>} : vector<16x128xf32>, vector<128x128xf32>, vector<16x128xf32> -> vector<16x128xf32>
    %c0_3 = arith.constant 0 : index
    %c0_4 = arith.constant 0 : index
    %3 = vector.load %arg3[%c0_3, %c0_4] : memref<16x128xf32, #tpu.memory_space<vmem>>, vector<16x128xf32>
    tpu.vector_store %arg3[%c0_3, %c0_4], %2 {strides = array<i32>} : memref<16x128xf32, #tpu.memory_space<vmem>>, vector<16x128xf32>,
    return
  }
  func.func @transform_0(%arg0: i32) -> (i32, i32) {
    %c0_i32 = arith.constant 0 : i32
    %c0_i32_0 = arith.constant 0 : i32
    return %arg0, %c0_i32 : i32, i32
  }
  func.func @transform_1(%arg0: i32) -> (i32, i32) {
    %c0_i32 = arith.constant 0 : i32
    %c0_i32_0 = arith.constant 0 : i32
    %c0_i32_1 = arith.constant 0 : i32
    return %c0_i32, %c0_i32_0 : i32, i32
  }
  func.func @transform_2(%arg0: i32) -> (i32, i32) {
    %c0_i32 = arith.constant 0 : i32
    %c0_i32_0 = arith.constant 0 : i32
    return %arg0, %c0_i32 : i32, i32
  }
}

</mosaic_0001>

<bundles_post_ra>
// kernel: tpu_custom_call.1
= control target key start
LH: loop header
LB: loop body
LE: loop exit
PB: predicated region body
PF: predicated region fallthrough
CT: control target
= control target key end

     0   :  { %7 = vsyncpa [#allocation3], 0  ;;  %s244_s0 = inlined_call_operand.hbm [shape: f32[16,128], index: 0, kind: input, shape index: {}]   ;;  %s245_s1 = inlined_call_operand.hbm [shape: f32[128,128], index: 1, kind: input, shape index: {}]   ;;  %s246_s2 = inlined_call_operand.hbm [shape: f32[16,128], index: 2, kind: output, shape index: {}]  }
   0x1   :  { %8 = vsyncpa [#allocation6], 0 }
   0x2   :  { %9 = vsyncpa [#allocation4], 0  ;;  %s14_s11 = sshll.u32 %s244_s0, 4  ;;  %s206_s12 = smov [#allocation2]   ;;  %s15_s11 = int_to_ptr.hbm [resolvable:$true] %s14_s11 }
   0x3   :  { %s16_s13 = sshll.u32 %s206_s12, 4  ;;  %s27_s16 = sshll.u32 %s245_s1, 4  ;;  %s17_s13 = int_to_ptr.vmem [resolvable:$true] %s16_s13  ;;  %s28_s16 = int_to_ptr.hbm [resolvable:$true] %s27_s16 }
   0x4   :  { %s207_s17 = smov 128   ;;  %s208_s18 = smov 8  }
   0x5   :  { %22 = dma.hbm_to_vmem [thread:$0]  %s15_s11, 256, %s17_s13, [#allocation3], %s207_s17, %s207_s17, %s208_s18  }
   0x6   :  { %s209_s19 = smov [#allocation5]  }
   0x7   :  { %s29_s20 = sshll.u32 %s209_s19, 4  ;;  %s30_s20 = int_to_ptr.vmem [resolvable:$true] %s29_s20 }
   0x8   :  { %35 = dma.hbm_to_vmem [thread:$0]  %s28_s16, 2048, %s30_s20, [#allocation6], %s207_s17, %s207_s17, %s208_s18  }
   0x9   :  { %200 = dma.done.wait [#allocation3], 256  }
   0xa   :  { %201 = vsyncadd [#allocation3], 4294967040 }
   0xb   :  { %202 = dma.done.wait [#allocation6], 2048  }
   0xc   :  { %203 = vsyncadd [#allocation6], 4294965248  ;;  %v61_v0 = vld [vmem:[#allocation5 + $0x78] sm:$0xff]  ;;  %v60_v1 = vld [vmem:[#allocation5 + $0x70] sm:$0xff]  ;;  %s210_s0 = smov [#allocation7]   ;;  %s93_s23 = sshll.u32 %s246_s2, 4  ;;  %s94_s23 = int_to_ptr.hbm [resolvable:$true] %s93_s23 }
   0xd   :  { %62 = vmatpush.msra.mxu0 %v61_v0  ;;  %107 = vmatpush.msra.mxu1 %v61_v0  ;;  %v59_v2 = vld [vmem:[#allocation5 + $0x68] sm:$0xff]  ;;  %v58_v3 = vld [vmem:[#allocation5 + $0x60] sm:$0xff]  ;;  %v57_v4 = vld [vmem:[#allocation5 + $0x58] sm:$0xff]  ;;  %s91_s1 = sshll.u32 %s210_s0, 4  ;;  %s92_s1 = int_to_ptr.vmem [resolvable:$true] %s91_s1 }
   0xe   :  { %v56_v5 = vld [vmem:[#allocation5 + $0x50] sm:$0xff]  ;;  %v55_v6 = vld [vmem:[#allocation5 + $0x48] sm:$0xff]  ;;  %v54_v7 = vld [vmem:[#allocation5 + $0x40] sm:$0xff] }
   0xf   :  { %63 = vmatpush.msra.mxu0 %v60_v1  ;;  %108 = vmatpush.msra.mxu1 %v60_v1  ;;  %v53_v8 = vld [vmem:[#allocation5 + $0x38] sm:$0xff]  ;;  %v52_v9 = vld [vmem:[#allocation5 + $0x30] sm:$0xff]  ;;  %v51_v10 = vld [vmem:[#allocation5 + $0x28] sm:$0xff] }
  0x10   :  { %v50_v11 = vld [vmem:[#allocation5 + $0x20] sm:$0xff]  ;;  %v49_v12 = vld [vmem:[#allocation5 + $0x18] sm:$0xff]  ;;  %v48_v13 = vld [vmem:[#allocation5 + $0x10] sm:$0xff] }
  0x11   :  { %64 = vmatpush.msra.mxu0 %v59_v2  ;;  %109 = vmatpush.msra.mxu1 %v59_v2  ;;  %v47_v14 = vld [vmem:[#allocation5 + $0x8] sm:$0xff]  ;;  %v46_v15 = vld [vmem:[#allocation5] sm:$0xff]  ;;  %v44_v16 = vld [vmem:[#allocation2] sm:$0xff] }
  0x12   :  { %v45_v17 = vld [vmem:[#allocation2 + $0x8] sm:$0xff] }
  0x13   :  { %65 = vmatpush.msra.mxu0 %v58_v3  ;;  %110 = vmatpush.msra.mxu1 %v58_v3 }
  0x15   :  { %66 = vmatpush.msra.mxu0 %v57_v4  ;;  %111 = vmatpush.msra.mxu1 %v57_v4 }
  0x17   :  { %67 = vmatpush.msra.mxu0 %v56_v5  ;;  %112 = vmatpush.msra.mxu1 %v56_v5 }
  0x19   :  { %68 = vmatpush.msra.mxu0 %v55_v6  ;;  %113 = vmatpush.msra.mxu1 %v55_v6 }
  0x1b   :  { %69 = vmatpush.msra.mxu0 %v54_v7  ;;  %114 = vmatpush.msra.mxu1 %v54_v7 }
  0x1d   :  { %70 = vmatpush.msra.mxu0 %v53_v8  ;;  %115 = vmatpush.msra.mxu1 %v53_v8 }
  0x1f   :  { %71 = vmatpush.msra.mxu0 %v52_v9  ;;  %116 = vmatpush.msra.mxu1 %v52_v9 }
  0x21   :  { %72 = vmatpush.msra.mxu0 %v51_v10  ;;  %117 = vmatpush.msra.mxu1 %v51_v10 }
  0x23   :  { %73 = vmatpush.msra.mxu0 %v50_v11  ;;  %118 = vmatpush.msra.mxu1 %v50_v11 }
  0x25   :  { %74 = vmatpush.msra.mxu0 %v49_v12  ;;  %119 = vmatpush.msra.mxu1 %v49_v12 }
  0x27   :  { %75 = vmatpush.msra.mxu0 %v48_v13  ;;  %120 = vmatpush.msra.mxu1 %v48_v13 }
  0x29   :  { %76 = vmatpush.msra.mxu0 %v47_v14  ;;  %121 = vmatpush.msra.mxu1 %v47_v14 }
  0x2b   :  { %77 = vmatpush.msra.mxu0 %v46_v15  ;;  %122 = vmatpush.msra.mxu1 %v46_v15 }
  0x2c   :  { %78 = vmatmul.f32.vlgmr.msra.gmra.mxu0 %v44_v16  ;;  %81 = vmatmul.f32.vlgmr.msra.gmra.mxu1 %v45_v17 }
  0xa9   :  { %v79_v18 = vpop.f32.mrf.mxu0  ;;  %v82_v19 = vpop.f32.mrf.mxu1 }
  0xaa   :  { %85 = vst [vmem:[#allocation7] sm:$0xff] %v79_v18 }
  0xab   :  { %86 = vst [vmem:[#allocation7 + $0x8] sm:$0xff] %v82_v19 }
  0xac   :  { %99 = dma.vmem_to_hbm [thread:$0]  %s92_s1, 256, %s94_s23, [#allocation4], %s207_s17, %s207_s17, %s208_s18  }
  0xad   :  { %204 = dma.done.wait [#allocation4], 256  }
  0xae   :  { %205 = vsyncadd [#allocation4], 4294967040 }
  0xaf   :  { %104 = vsyncpa [#allocation3], 1 }
  0xb0   :  { %105 = vsyncpa [#allocation6], 1 }
  0xb1   :  { %106 = vsyncpa [#allocation4], 1 }

</bundles_post_ra>
